<compile_context>
chip_gen: v6e
topology: v6e:2x2x1
jax: 0.10.0
libtpu: 0.0.40
codegen_flags: <defaults>
</compile_context>

<pallas_src>
import math

import jax
import jax.numpy as jnp
from jax import lax
from jax.experimental import pallas as pl
from jax.experimental.pallas import tpu as pltpu

INPUT_DIM = 118
HIDDEN_DIM = 64
OUTPUT_DIM = 130
NUM_BLOCKS = 3
BN_EPS = 1e-5

# Lane-dense padded dimensions used inside the kernel.
PAD_IN = 128     # 118 -> 128 input features
PAD_HID = 128    # 64  -> 128 hidden features (extra lanes stay identically 0)
PAD_OUT = 256    # 130 -> 256 output features

N_MATS = 1 + 2 * NUM_BLOCKS          # w_in + (w1, w2) per block = 7
W_ROWS = PAD_HID * N_MATS            # 896 rows of bf16 weight slab
N_BN = 1 + 2 * NUM_BLOCKS            # 7 BatchNorm layers
BN_ROWS = 16                         # 14 used (gamma,beta pairs), padded to 16
BIAS_LANE = HIDDEN_DIM               # padded hidden lane set to 1.0 -> b_out row

MAX_BATCH = 4096                     # conservative whole-batch VMEM guard (v7x 64 MiB)


def _bn_train(h, gamma, beta):
    """nn.BatchNorm1d training-mode forward; two-pass (shifted) variance."""
    m = jnp.mean(h, axis=0, keepdims=True)
    d = h - m
    var = jnp.mean(d * d, axis=0, keepdims=True)
    scale = gamma * lax.rsqrt(var + BN_EPS)     # EUP rsqrt
    return d * scale + beta


def resnet_kernel(x_ref, w_ref, bn_ref, wout_ref, out_ref):
    # Static carving of the packed parameter slabs (zero-cost ref slices).
    def W(j):                                    # j-th [128,128] bf16 weight
        return w_ref[PAD_HID * j: PAD_HID * (j + 1), :]

    def gamma(k):                                # k-th BN gamma, [1,128] f32
        return bn_ref[2 * k: 2 * k + 1, :]

    def beta(k):                                 # k-th BN beta, [1,128] f32
        return bn_ref[2 * k + 1: 2 * k + 2, :]

    x = x_ref[...]                                               # [B,128] bf16

    # input_layer: Linear(118,64) -> BN -> ReLU   (pre-BN bias cancels)
    h = jnp.dot(x, W(0), preferred_element_type=jnp.float32)    # f32 acc
    h = jnp.maximum(_bn_train(h, gamma(0), beta(0)), 0.0)

    # 3 residual blocks, identity shortcut (in_dim == out_dim), unrolled.
    for i in range(NUM_BLOCKS):
        residual = h
        u = jnp.dot(h.astype(jnp.bfloat16), W(1 + 2 * i),
                    preferred_element_type=jnp.float32)
        u = jnp.maximum(_bn_train(u, gamma(1 + 2 * i), beta(1 + 2 * i)), 0.0)
        u = jnp.dot(u.astype(jnp.bfloat16), W(2 + 2 * i),
                    preferred_element_type=jnp.float32)
        u = _bn_train(u, gamma(2 + 2 * i), beta(2 + 2 * i))
        h = jnp.maximum(u + residual, 0.0)

    # output_layer: Linear(64,130) padded to [128,256].  Bias folded into the
    # matmul: padded lane BIAS_LANE of h is forced to 1.0 and row BIAS_LANE of
    # the output-weight slab holds b_out, so the epilogue is MXU -> store.
    lane = lax.broadcasted_iota(jnp.int32, h.shape, 1)
    h = jnp.where(lane == BIAS_LANE, 1.0, h)
    out = jnp.dot(h.astype(jnp.bfloat16), wout_ref[...],
                  preferred_element_type=jnp.float32)
    out_ref[...] = out.astype(out_ref.dtype)


def init_params(key):
    """Deterministic parameter init matching PyTorch shapes/defaults.

    Linear weights are stored transposed vs. PyTorch ([in, out]).  The hidden
    linear biases (b_in, b1, b2) exist for fidelity with the module's parameter
    set but are NOT used by the kernel: a bias added immediately before a
    training-mode BatchNorm cancels exactly.
    """

    def linear(k, fan_in, fan_out):
        kw, kb = jax.random.split(k)
        bound = 1.0 / math.sqrt(fan_in)
        w = jax.random.uniform(kw, (fan_in, fan_out), jnp.float32, -bound, bound)
        b = jax.random.uniform(kb, (1, fan_out), jnp.float32, -bound, bound)
        return w, b

    keys = jax.random.split(key, 2 + 2 * NUM_BLOCKS)

    w_in, b_in = linear(keys[0], INPUT_DIM, HIDDEN_DIM)
    w_out, b_out = linear(keys[1], HIDDEN_DIM, OUTPUT_DIM)

    w1s, b1s, w2s, b2s = [], [], [], []
    for i in range(NUM_BLOCKS):
        w1, b1 = linear(keys[2 + 2 * i], HIDDEN_DIM, HIDDEN_DIM)
        w2, b2 = linear(keys[3 + 2 * i], HIDDEN_DIM, HIDDEN_DIM)
        w1s.append(w1); b1s.append(b1); w2s.append(w2); b2s.append(b2)

    ones = jnp.ones((1, HIDDEN_DIM), jnp.float32)
    zeros = jnp.zeros((1, HIDDEN_DIM), jnp.float32)
    ones3 = jnp.ones((NUM_BLOCKS, 1, HIDDEN_DIM), jnp.float32)
    zeros3 = jnp.zeros((NUM_BLOCKS, 1, HIDDEN_DIM), jnp.float32)

    return {
        "w_in": w_in, "b_in": b_in, "g_in": ones, "beta_in": zeros,
        "w1": jnp.stack(w1s), "b1": jnp.stack(b1s), "g1": ones3, "beta1": zeros3,
        "w2": jnp.stack(w2s), "b2": jnp.stack(b2s), "g2": ones3, "beta2": zeros3,
        "w_out": w_out, "b_out": b_out,
    }


def pack_params(params):
    """Pack parameters into three lane-dense slabs.  Call ONCE, reuse per call.

    Returns:
      wslab    [896, 128] bf16 : 7 square weight matrices (zero-padded).
      bnslab   [ 16, 128] f32  : (gamma, beta) rows for 7 BN layers; padded
                                 gamma lanes are 0.0 (defensive), spare rows 0.
      woutslab [128, 256] bf16 : padded output weight; row BIAS_LANE = b_out.
    """

    def pad_mat(w, rows, cols):
        return jnp.zeros((rows, cols), jnp.float32).at[:w.shape[0], :w.shape[1]].set(w)

    def bn_row(v):
        v = v.reshape(-1)
        return jnp.zeros((1, PAD_HID), jnp.float32).at[0, :v.shape[0]].set(v)

    # --- [896, 128] bf16 weight slab ---
    mats = [pad_mat(params["w_in"], PAD_HID, PAD_HID)]
    for i in range(NUM_BLOCKS):
        mats.append(pad_mat(params["w1"][i], PAD_HID, PAD_HID))
        mats.append(pad_mat(params["w2"][i], PAD_HID, PAD_HID))
    wslab = jnp.concatenate(mats, axis=0).astype(jnp.bfloat16)
    assert wslab.shape == (W_ROWS, PAD_HID)

    # --- [16, 128] f32 BN slab (gamma/beta pairs; pads are exactly 0) ---
    bn_rows = [bn_row(params["g_in"]), bn_row(params["beta_in"])]
    for i in range(NUM_BLOCKS):
        bn_rows += [bn_row(params["g1"][i]), bn_row(params["beta1"][i]),
                    bn_row(params["g2"][i]), bn_row(params["beta2"][i])]
    bn_rows.append(jnp.zeros((BN_ROWS - 2 * N_BN, PAD_HID), jnp.float32))
    bnslab = jnp.concatenate(bn_rows, axis=0)
    assert bnslab.shape == (BN_ROWS, PAD_HID)

    # --- [128, 256] bf16 output slab: weight + bias folded into row BIAS_LANE ---
    wout = jnp.zeros((PAD_HID, PAD_OUT), jnp.float32)
    wout = wout.at[:HIDDEN_DIM, :OUTPUT_DIM].set(params["w_out"])
    wout = wout.at[BIAS_LANE, :OUTPUT_DIM].set(params["b_out"].reshape(-1))
    woutslab = wout.astype(jnp.bfloat16)

    return wslab, bnslab, woutslab


@jax.jit
def structured_resnet(x, wslab, bnslab, woutslab):
    B = x.shape[0]
    # Training-mode BN needs the whole batch resident in VMEM; guard the
    # whole-batch ceiling conservatively for v7x's 64 MiB VMEM.
    assert B <= MAX_BATCH, "batch too large for whole-batch-in-VMEM BN kernel"
    # TODO(synk): two-pass (stats pass + apply pass via HBM staging) fallback
    #             for batches beyond the VMEM ceiling.

    # Pad + cast x to bf16 lane-dense [B, 128] (single fused XLA pass).
    x_pad = jnp.zeros((B, PAD_IN), jnp.bfloat16).at[:, :INPUT_DIM].set(
        x.astype(jnp.bfloat16))

    vmem = pl.BlockSpec(memory_space=pltpu.MemorySpace.VMEM)
    out = pl.pallas_call(
        resnet_kernel,
        out_shape=jax.ShapeDtypeStruct((B, PAD_OUT), jnp.float32),
        in_specs=[vmem, vmem, vmem, vmem],
        out_specs=vmem,
    )(x_pad, wslab, bnslab, woutslab)
    return out[:, :OUTPUT_DIM]


def _ref_forward(x, params):
    """Pure-JAX f32 reference identical to the PyTorch module (training-mode
    BN), *including* the pre-BN biases, to validate that dropping them is exact."""
    def bn(h, g, b):
        m = jnp.mean(h, axis=0, keepdims=True)
        v = jnp.mean(jnp.square(h - m), axis=0, keepdims=True)
        return (h - m) * lax.rsqrt(v + BN_EPS) * g + b

    h = x @ params["w_in"] + params["b_in"]
    h = jnp.maximum(bn(h, params["g_in"], params["beta_in"]), 0.0)
    for i in range(NUM_BLOCKS):
        r = h
        u = h @ params["w1"][i] + params["b1"][i]
        u = jnp.maximum(bn(u, params["g1"][i], params["beta1"][i]), 0.0)
        u = u @ params["w2"][i] + params["b2"][i]
        u = bn(u, params["g2"][i], params["beta2"][i])
        h = jnp.maximum(u + r, 0.0)
    return h @ params["w_out"] + params["b_out"]


if __name__ == "__main__":
    key = jax.random.PRNGKey(0)
    kx, kp = jax.random.split(key)

    B = 16  # BN statistics are over the real batch; batch dim is never padded.
    x = jax.random.normal(kx, (B, INPUT_DIM), dtype=jnp.float32)
    params = init_params(kp)

    # Pack once (outside the per-call jit path); reuse the slabs every call.
    wslab, bnslab, woutslab = pack_params(params)
    wslab, bnslab, woutslab = jax.block_until_ready((wslab, bnslab, woutslab))

    y = structured_resnet(x, wslab, bnslab, woutslab)
    jax.block_until_ready(y)
    assert y.shape == (B, OUTPUT_DIM) and y.dtype == jnp.float32

    y_ref = _ref_forward(x, params)
    err = float(jnp.max(jnp.abs(y - y_ref)))
    assert err < 5e-2, f"kernel/reference mismatch, max abs err = {err}"

    print("KERNEL_OK")
</pallas_src>

<mosaic_0001>
module attributes {stable_mosaic.version = 11 : i64} {
  func.func @resnet_kernel(%arg0: memref<16x128xbf16, #tpu.memory_space<vmem>>, %arg1: memref<896x128xbf16, #tpu.memory_space<vmem>>, %arg2: memref<16x128xf32, #tpu.memory_space<vmem>>, %arg3: memref<128x256xbf16, #tpu.memory_space<vmem>>, %arg4: memref<16x256xf32, #tpu.memory_space<vmem>>) attributes {dimension_semantics = [], scalar_prefetch = 0 : i64, scratch_operands = 0 : i64, tpu.core_type = #tpu.core_type<tc>} {
    %c0 = arith.constant 0 : index
    %c0_0 = arith.constant 0 : index
    %0 = vector.load %arg0[%c0, %c0_0] : memref<16x128xbf16, #tpu.memory_space<vmem>>, vector<16x128xbf16>
    %c0_1 = arith.constant 0 : index
    %c0_2 = arith.constant 0 : index
    %1 = vector.load %arg1[%c0_1, %c0_2] : memref<896x128xbf16, #tpu.memory_space<vmem>>, vector<128x128xbf16>
    %cst = arith.constant dense<0.000000e+00> : vector<16x128xf32>
    %2 = tpu.matmul %0, %1, %cst {dimension_numbers = #tpu.dot_dimension_numbers<[1], [0], [0], [1], [0, 0, 1, 1], [], []>} : vector<16x128xbf16>, vector<128x128xbf16>, vector<16x128xf32> -> vector<16x128xf32>
    %c0_3 = arith.constant 0 : index
    %c0_4 = arith.constant 0 : index
    %3 = vector.load %arg2[%c0_3, %c0_4] : memref<16x128xf32, #tpu.memory_space<vmem>>, vector<1x128xf32>
    %c1 = arith.constant 1 : index
    %c0_5 = arith.constant 0 : index
    %4 = vector.load %arg2[%c1, %c0_5] : memref<16x128xf32, #tpu.memory_space<vmem>>, vector<1x128xf32>
    %cst_6 = arith.constant dense<0.000000e+00> : vector<128xf32>
    %5 = vector.multi_reduction <add>, %2, %cst_6 [0] : vector<16x128xf32> to vector<128xf32>
    %6 = vector.shape_cast %5 : vector<128xf32> to vector<1x128xf32>
    %cst_7 = arith.constant 1.600000e+01 : f32
    %7 = vector.broadcast %cst_7 : f32 to vector<1x128xf32>
    %8 = arith.divf %6, %7 : vector<1x128xf32>
    %9 = vector.broadcast %8 : vector<1x128xf32> to vector<16x128xf32>
    %10 = arith.subf %2, %9 : vector<16x128xf32>
    %11 = arith.mulf %10, %10 : vector<16x128xf32>
    %cst_8 = arith.constant dense<0.000000e+00> : vector<128xf32>
    %12 = vector.multi_reduction <add>, %11, %cst_8 [0] : vector<16x128xf32> to vector<128xf32>
    %13 = vector.shape_cast %12 : vector<128xf32> to vector<1x128xf32>
    %cst_9 = arith.constant 1.600000e+01 : f32
    %14 = vector.broadcast %cst_9 : f32 to vector<1x128xf32>
    %15 = arith.divf %13, %14 : vector<1x128xf32>
    %cst_10 = arith.constant 9.99999974E-6 : f32
    %16 = vector.broadcast %cst_10 : f32 to vector<1x128xf32>
    %17 = arith.addf %15, %16 : vector<1x128xf32>
    %18 = math.rsqrt %17 : vector<1x128xf32>
    %19 = arith.mulf %3, %18 : vector<1x128xf32>
    %20 = vector.broadcast %19 : vector<1x128xf32> to vector<16x128xf32>
    %21 = arith.mulf %10, %20 : vector<16x128xf32>
    %22 = vector.broadcast %4 : vector<1x128xf32> to vector<16x128xf32>
    %23 = arith.addf %21, %22 : vector<16x128xf32>
    %cst_11 = arith.constant 0.000000e+00 : f32
    %24 = vector.broadcast %cst_11 : f32 to vector<16x128xf32>
    %25 = arith.maximumf %23, %24 : vector<16x128xf32>
    %26 = arith.truncf %25 : vector<16x128xf32> to vector<16x128xbf16>
    %c128 = arith.constant 128 : index
    %c0_12 = arith.constant 0 : index
    %27 = vector.load %arg1[%c128, %c0_12] : memref<896x128xbf16, #tpu.memory_space<vmem>>, vector<128x128xbf16>
    %cst_13 = arith.constant dense<0.000000e+00> : vector<16x128xf32>
    %28 = tpu.matmul %26, %27, %cst_13 {dimension_numbers = #tpu.dot_dimension_numbers<[1], [0], [0], [1], [0, 0, 1, 1], [], []>} : vector<16x128xbf16>, vector<128x128xbf16>, vector<16x128xf32> -> vector<16x128xf32>
    %c2 = arith.constant 2 : index
    %c0_14 = arith.constant 0 : index
    %29 = vector.load %arg2[%c2, %c0_14] : memref<16x128xf32, #tpu.memory_space<vmem>>, vector<1x128xf32>
    %c3 = arith.constant 3 : index
    %c0_15 = arith.constant 0 : index
    %30 = vector.load %arg2[%c3, %c0_15] : memref<16x128xf32, #tpu.memory_space<vmem>>, vector<1x128xf32>
    %cst_16 = arith.constant dense<0.000000e+00> : vector<128xf32>
    %31 = vector.multi_reduction <add>, %28, %cst_16 [0] : vector<16x128xf32> to vector<128xf32>
    %32 = vector.shape_cast %31 : vector<128xf32> to vector<1x128xf32>
    %cst_17 = arith.constant 1.600000e+01 : f32
    %33 = vector.broadcast %cst_17 : f32 to vector<1x128xf32>
    %34 = arith.divf %32, %33 : vector<1x128xf32>
    %35 = vector.broadcast %34 : vector<1x128xf32> to vector<16x128xf32>
    %36 = arith.subf %28, %35 : vector<16x128xf32>
    %37 = arith.mulf %36, %36 : vector<16x128xf32>
    %cst_18 = arith.constant dense<0.000000e+00> : vector<128xf32>
    %38 = vector.multi_reduction <add>, %37, %cst_18 [0] : vector<16x128xf32> to vector<128xf32>
    %39 = vector.shape_cast %38 : vector<128xf32> to vector<1x128xf32>
    %cst_19 = arith.constant 1.600000e+01 : f32
    %40 = vector.broadcast %cst_19 : f32 to vector<1x128xf32>
    %41 = arith.divf %39, %40 : vector<1x128xf32>
    %cst_20 = arith.constant 9.99999974E-6 : f32
    %42 = vector.broadcast %cst_20 : f32 to vector<1x128xf32>
    %43 = arith.addf %41, %42 : vector<1x128xf32>
    %44 = math.rsqrt %43 : vector<1x128xf32>
    %45 = arith.mulf %29, %44 : vector<1x128xf32>
    %46 = vector.broadcast %45 : vector<1x128xf32> to vector<16x128xf32>
    %47 = arith.mulf %36, %46 : vector<16x128xf32>
    %48 = vector.broadcast %30 : vector<1x128xf32> to vector<16x128xf32>
    %49 = arith.addf %47, %48 : vector<16x128xf32>
    %cst_21 = arith.constant 0.000000e+00 : f32
    %50 = vector.broadcast %cst_21 : f32 to vector<16x128xf32>
    %51 = arith.maximumf %49, %50 : vector<16x128xf32>
    %52 = arith.truncf %51 : vector<16x128xf32> to vector<16x128xbf16>
    %c256 = arith.constant 256 : index
    %c0_22 = arith.constant 0 : index
    %53 = vector.load %arg1[%c256, %c0_22] : memref<896x128xbf16, #tpu.memory_space<vmem>>, vector<128x128xbf16>
    %cst_23 = arith.constant dense<0.000000e+00> : vector<16x128xf32>
    %54 = tpu.matmul %52, %53, %cst_23 {dimension_numbers = #tpu.dot_dimension_numbers<[1], [0], [0], [1], [0, 0, 1, 1], [], []>} : vector<16x128xbf16>, vector<128x128xbf16>, vector<16x128xf32> -> vector<16x128xf32>
    %c4 = arith.constant 4 : index
    %c0_24 = arith.constant 0 : index
    %55 = vector.load %arg2[%c4, %c0_24] : memref<16x128xf32, #tpu.memory_space<vmem>>, vector<1x128xf32>
    %c5 = arith.constant 5 : index
    %c0_25 = arith.constant 0 : index
    %56 = vector.load %arg2[%c5, %c0_25] : memref<16x128xf32, #tpu.memory_space<vmem>>, vector<1x128xf32>
    %cst_26 = arith.constant dense<0.000000e+00> : vector<128xf32>
    %57 = vector.multi_reduction <add>, %54, %cst_26 [0] : vector<16x128xf32> to vector<128xf32>
    %58 = vector.shape_cast %57 : vector<128xf32> to vector<1x128xf32>
    %cst_27 = arith.constant 1.600000e+01 : f32
    %59 = vector.broadcast %cst_27 : f32 to vector<1x128xf32>
    %60 = arith.divf %58, %59 : vector<1x128xf32>
    %61 = vector.broadcast %60 : vector<1x128xf32> to vector<16x128xf32>
    %62 = arith.subf %54, %61 : vector<16x128xf32>
    %63 = arith.mulf %62, %62 : vector<16x128xf32>
    %cst_28 = arith.constant dense<0.000000e+00> : vector<128xf32>
    %64 = vector.multi_reduction <add>, %63, %cst_28 [0] : vector<16x128xf32> to vector<128xf32>
    %65 = vector.shape_cast %64 : vector<128xf32> to vector<1x128xf32>
    %cst_29 = arith.constant 1.600000e+01 : f32
    %66 = vector.broadcast %cst_29 : f32 to vector<1x128xf32>
    %67 = arith.divf %65, %66 : vector<1x128xf32>
    %cst_30 = arith.constant 9.99999974E-6 : f32
    %68 = vector.broadcast %cst_30 : f32 to vector<1x128xf32>
    %69 = arith.addf %67, %68 : vector<1x128xf32>
    %70 = math.rsqrt %69 : vector<1x128xf32>
    %71 = arith.mulf %55, %70 : vector<1x128xf32>
    %72 = vector.broadcast %71 : vector<1x128xf32> to vector<16x128xf32>
    %73 = arith.mulf %62, %72 : vector<16x128xf32>
    %74 = vector.broadcast %56 : vector<1x128xf32> to vector<16x128xf32>
    %75 = arith.addf %73, %74 : vector<16x128xf32>
    %76 = arith.addf %75, %25 : vector<16x128xf32>
    %cst_31 = arith.constant 0.000000e+00 : f32
    %77 = vector.broadcast %cst_31 : f32 to vector<16x128xf32>
    %78 = arith.maximumf %76, %77 : vector<16x128xf32>
    %79 = arith.truncf %78 : vector<16x128xf32> to vector<16x128xbf16>
    %c384 = arith.constant 384 : index
    %c0_32 = arith.constant 0 : index
    %80 = vector.load %arg1[%c384, %c0_32] : memref<896x128xbf16, #tpu.memory_space<vmem>>, vector<128x128xbf16>
    %cst_33 = arith.constant dense<0.000000e+00> : vector<16x128xf32>
    %81 = tpu.matmul %79, %80, %cst_33 {dimension_numbers = #tpu.dot_dimension_numbers<[1], [0], [0], [1], [0, 0, 1, 1], [], []>} : vector<16x128xbf16>, vector<128x128xbf16>, vector<16x128xf32> -> vector<16x128xf32>
    %c6 = arith.constant 6 : index
    %c0_34 = arith.constant 0 : index
    %82 = vector.load %arg2[%c6, %c0_34] : memref<16x128xf32, #tpu.memory_space<vmem>>, vector<1x128xf32>
    %c7 = arith.constant 7 : index
    %c0_35 = arith.constant 0 : index
    %83 = vector.load %arg2[%c7, %c0_35] : memref<16x128xf32, #tpu.memory_space<vmem>>, vector<1x128xf32>
    %cst_36 = arith.constant dense<0.000000e+00> : vector<128xf32>
    %84 = vector.multi_reduction <add>, %81, %cst_36 [0] : vector<16x128xf32> to vector<128xf32>
    %85 = vector.shape_cast %84 : vector<128xf32> to vector<1x128xf32>
    %cst_37 = arith.constant 1.600000e+01 : f32
    %86 = vector.broadcast %cst_37 : f32 to vector<1x128xf32>
    %87 = arith.divf %85, %86 : vector<1x128xf32>
    %88 = vector.broadcast %87 : vector<1x128xf32> to vector<16x128xf32>
    %89 = arith.subf %81, %88 : vector<16x128xf32>
    %90 = arith.mulf %89, %89 : vector<16x128xf32>
    %cst_38 = arith.constant dense<0.000000e+00> : vector<128xf32>
    %91 = vector.multi_reduction <add>, %90, %cst_38 [0] : vector<16x128xf32> to vector<128xf32>
    %92 = vector.shape_cast %91 : vector<128xf32> to vector<1x128xf32>
    %cst_39 = arith.constant 1.600000e+01 : f32
    %93 = vector.broadcast %cst_39 : f32 to vector<1x128xf32>
    %94 = arith.divf %92, %93 : vector<1x128xf32>
    %cst_40 = arith.constant 9.99999974E-6 : f32
    %95 = vector.broadcast %cst_40 : f32 to vector<1x128xf32>
    %96 = arith.addf %94, %95 : vector<1x128xf32>
    %97 = math.rsqrt %96 : vector<1x128xf32>
    %98 = arith.mulf %82, %97 : vector<1x128xf32>
    %99 = vector.broadcast %98 : vector<1x128xf32> to vector<16x128xf32>
    %100 = arith.mulf %89, %99 : vector<16x128xf32>
    %101 = vector.broadcast %83 : vector<1x128xf32> to vector<16x128xf32>
    %102 = arith.addf %100, %101 : vector<16x128xf32>
    %cst_41 = arith.constant 0.000000e+00 : f32
    %103 = vector.broadcast %cst_41 : f32 to vector<16x128xf32>
    %104 = arith.maximumf %102, %103 : vector<16x128xf32>
    %105 = arith.truncf %104 : vector<16x128xf32> to vector<16x128xbf16>
    %c512 = arith.constant 512 : index
    %c0_42 = arith.constant 0 : index
    %106 = vector.load %arg1[%c512, %c0_42] : memref<896x128xbf16, #tpu.memory_space<vmem>>, vector<128x128xbf16>
    %cst_43 = arith.constant dense<0.000000e+00> : vector<16x128xf32>
    %107 = tpu.matmul %105, %106, %cst_43 {dimension_numbers = #tpu.dot_dimension_numbers<[1], [0], [0], [1], [0, 0, 1, 1], [], []>} : vector<16x128xbf16>, vector<128x128xbf16>, vector<16x128xf32> -> vector<16x128xf32>
    %c8 = arith.constant 8 : index
    %c0_44 = arith.constant 0 : index
    %108 = vector.load %arg2[%c8, %c0_44] : memref<16x128xf32, #tpu.memory_space<vmem>>, vector<1x128xf32>
    %c9 = arith.constant 9 : index
    %c0_45 = arith.constant 0 : index
    %109 = vector.load %arg2[%c9, %c0_45] : memref<16x128xf32, #tpu.memory_space<vmem>>, vector<1x128xf32>
    %cst_46 = arith.constant dense<0.000000e+00> : vector<128xf32>
    %110 = vector.multi_reduction <add>, %107, %cst_46 [0] : vector<16x128xf32> to vector<128xf32>
    %111 = vector.shape_cast %110 : vector<128xf32> to vector<1x128xf32>
    %cst_47 = arith.constant 1.600000e+01 : f32
    %112 = vector.broadcast %cst_47 : f32 to vector<1x128xf32>
    %113 = arith.divf %111, %112 : vector<1x128xf32>
    %114 = vector.broadcast %113 : vector<1x128xf32> to vector<16x128xf32>
    %115 = arith.subf %107, %114 : vector<16x128xf32>
    %116 = arith.mulf %115, %115 : vector<16x128xf32>
    %cst_48 = arith.constant dense<0.000000e+00> : vector<128xf32>
    %117 = vector.multi_reduction <add>, %116, %cst_48 [0] : vector<16x128xf32> to vector<128xf32>
    %118 = vector.shape_cast %117 : vector<128xf32> to vector<1x128xf32>
    %cst_49 = arith.constant 1.600000e+01 : f32
    %119 = vector.broadcast %cst_49 : f32 to vector<1x128xf32>
    %120 = arith.divf %118, %119 : vector<1x128xf32>
    %cst_50 = arith.constant 9.99999974E-6 : f32
    %121 = vector.broadcast %cst_50 : f32 to vector<1x128xf32>
    %122 = arith.addf %120, %121 : vector<1x128xf32>
    %123 = math.rsqrt %122 : vector<1x128xf32>
    %124 = arith.mulf %108, %123 : vector<1x128xf32>
    %125 = vector.broadcast %124 : vector<1x128xf32> to vector<16x128xf32>
    %126 = arith.mulf %115, %125 : vector<16x128xf32>
    %127 = vector.broadcast %109 : vector<1x128xf32> to vector<16x128xf32>
    %128 = arith.addf %126, %127 : vector<16x128xf32>
    %129 = arith.addf %128, %78 : vector<16x128xf32>
    %cst_51 = arith.constant 0.000000e+00 : f32
    %130 = vector.broadcast %cst_51 : f32 to vector<16x128xf32>
    %131 = arith.maximumf %129, %130 : vector<16x128xf32>
    %132 = arith.truncf %131 : vector<16x128xf32> to vector<16x128xbf16>
    %c640 = arith.constant 640 : index
    %c0_52 = arith.constant 0 : index
    %133 = vector.load %arg1[%c640, %c0_52] : memref<896x128xbf16, #tpu.memory_space<vmem>>, vector<128x128xbf16>
    %cst_53 = arith.constant dense<0.000000e+00> : vector<16x128xf32>
    %134 = tpu.matmul %132, %133, %cst_53 {dimension_numbers = #tpu.dot_dimension_numbers<[1], [0], [0], [1], [0, 0, 1, 1], [], []>} : vector<16x128xbf16>, vector<128x128xbf16>, vector<16x128xf32> -> vector<16x128xf32>
    %c10 = arith.constant 10 : index
    %c0_54 = arith.constant 0 : index
    %135 = vector.load %arg2[%c10, %c0_54] : memref<16x128xf32, #tpu.memory_space<vmem>>, vector<1x128xf32>
    %c11 = arith.constant 11 : index
    %c0_55 = arith.constant 0 : index
    %136 = vector.load %arg2[%c11, %c0_55] : memref<16x128xf32, #tpu.memory_space<vmem>>, vector<1x128xf32>
    %cst_56 = arith.constant dense<0.000000e+00> : vector<128xf32>
    %137 = vector.multi_reduction <add>, %134, %cst_56 [0] : vector<16x128xf32> to vector<128xf32>
    %138 = vector.shape_cast %137 : vector<128xf32> to vector<1x128xf32>
    %cst_57 = arith.constant 1.600000e+01 : f32
    %139 = vector.broadcast %cst_57 : f32 to vector<1x128xf32>
    %140 = arith.divf %138, %139 : vector<1x128xf32>
    %141 = vector.broadcast %140 : vector<1x128xf32> to vector<16x128xf32>
    %142 = arith.subf %134, %141 : vector<16x128xf32>
    %143 = arith.mulf %142, %142 : vector<16x128xf32>
    %cst_58 = arith.constant dense<0.000000e+00> : vector<128xf32>
    %144 = vector.multi_reduction <add>, %143, %cst_58 [0] : vector<16x128xf32> to vector<128xf32>
    %145 = vector.shape_cast %144 : vector<128xf32> to vector<1x128xf32>
    %cst_59 = arith.constant 1.600000e+01 : f32
    %146 = vector.broadcast %cst_59 : f32 to vector<1x128xf32>
    %147 = arith.divf %145, %146 : vector<1x128xf32>
    %cst_60 = arith.constant 9.99999974E-6 : f32
    %148 = vector.broadcast %cst_60 : f32 to vector<1x128xf32>
    %149 = arith.addf %147, %148 : vector<1x128xf32>
    %150 = math.rsqrt %149 : vector<1x128xf32>
    %151 = arith.mulf %135, %150 : vector<1x128xf32>
    %152 = vector.broadcast %151 : vector<1x128xf32> to vector<16x128xf32>
    %153 = arith.mulf %142, %152 : vector<16x128xf32>
    %154 = vector.broadcast %136 : vector<1x128xf32> to vector<16x128xf32>
    %155 = arith.addf %153, %154 : vector<16x128xf32>
    %cst_61 = arith.constant 0.000000e+00 : f32
    %156 = vector.broadcast %cst_61 : f32 to vector<16x128xf32>
    %157 = arith.maximumf %155, %156 : vector<16x128xf32>
    %158 = arith.truncf %157 : vector<16x128xf32> to vector<16x128xbf16>
    %c768 = arith.constant 768 : index
    %c0_62 = arith.constant 0 : index
    %159 = vector.load %arg1[%c768, %c0_62] : memref<896x128xbf16, #tpu.memory_space<vmem>>, vector<128x128xbf16>
    %cst_63 = arith.constant dense<0.000000e+00> : vector<16x128xf32>
    %160 = tpu.matmul %158, %159, %cst_63 {dimension_numbers = #tpu.dot_dimension_numbers<[1], [0], [0], [1], [0, 0, 1, 1], [], []>} : vector<16x128xbf16>, vector<128x128xbf16>, vector<16x128xf32> -> vector<16x128xf32>
    %c12 = arith.constant 12 : index
    %c0_64 = arith.constant 0 : index
    %161 = vector.load %arg2[%c12, %c0_64] : memref<16x128xf32, #tpu.memory_space<vmem>>, vector<1x128xf32>
    %c13 = arith.constant 13 : index
    %c0_65 = arith.constant 0 : index
    %162 = vector.load %arg2[%c13, %c0_65] : memref<16x128xf32, #tpu.memory_space<vmem>>, vector<1x128xf32>
    %cst_66 = arith.constant dense<0.000000e+00> : vector<128xf32>
    %163 = vector.multi_reduction <add>, %160, %cst_66 [0] : vector<16x128xf32> to vector<128xf32>
    %164 = vector.shape_cast %163 : vector<128xf32> to vector<1x128xf32>
    %cst_67 = arith.constant 1.600000e+01 : f32
    %165 = vector.broadcast %cst_67 : f32 to vector<1x128xf32>
    %166 = arith.divf %164, %165 : vector<1x128xf32>
    %167 = vector.broadcast %166 : vector<1x128xf32> to vector<16x128xf32>
    %168 = arith.subf %160, %167 : vector<16x128xf32>
    %169 = arith.mulf %168, %168 : vector<16x128xf32>
    %cst_68 = arith.constant dense<0.000000e+00> : vector<128xf32>
    %170 = vector.multi_reduction <add>, %169, %cst_68 [0] : vector<16x128xf32> to vector<128xf32>
    %171 = vector.shape_cast %170 : vector<128xf32> to vector<1x128xf32>
    %cst_69 = arith.constant 1.600000e+01 : f32
    %172 = vector.broadcast %cst_69 : f32 to vector<1x128xf32>
    %173 = arith.divf %171, %172 : vector<1x128xf32>
    %cst_70 = arith.constant 9.99999974E-6 : f32
    %174 = vector.broadcast %cst_70 : f32 to vector<1x128xf32>
    %175 = arith.addf %173, %174 : vector<1x128xf32>
    %176 = math.rsqrt %175 : vector<1x128xf32>
    %177 = arith.mulf %161, %176 : vector<1x128xf32>
    %178 = vector.broadcast %177 : vector<1x128xf32> to vector<16x128xf32>
    %179 = arith.mulf %168, %178 : vector<16x128xf32>
    %180 = vector.broadcast %162 : vector<1x128xf32> to vector<16x128xf32>
    %181 = arith.addf %179, %180 : vector<16x128xf32>
    %182 = arith.addf %181, %131 : vector<16x128xf32>
    %cst_71 = arith.constant 0.000000e+00 : f32
    %183 = vector.broadcast %cst_71 : f32 to vector<16x128xf32>
    %184 = arith.maximumf %182, %183 : vector<16x128xf32>
    %185 = tpu.iota {dimensions = array<i32: 1>} : vector<16x128xi32>
    %c64_i32 = arith.constant 64 : i32
    %186 = vector.broadcast %c64_i32 : i32 to vector<16x128xi32>
    %187 = arith.cmpi eq, %185, %186 : vector<16x128xi32>
    %cst_72 = arith.constant 1.000000e+00 : f32
    %188 = vector.broadcast %cst_72 : f32 to vector<16x128xf32>
    %189 = arith.select %187, %188, %184 : vector<16x128xi1>, vector<16x128xf32>
    %190 = arith.truncf %189 : vector<16x128xf32> to vector<16x128xbf16>
    %c0_73 = arith.constant 0 : index
    %c0_74 = arith.constant 0 : index
    %191 = vector.load %arg3[%c0_73, %c0_74] : memref<128x256xbf16, #tpu.memory_space<vmem>>, vector<128x256xbf16>
    %cst_75 = arith.constant dense<0.000000e+00> : vector<16x256xf32>
    %192 = tpu.matmul %190, %191, %cst_75 {dimension_numbers = #tpu.dot_dimension_numbers<[1], [0], [0], [1], [0, 0, 1, 1], [], []>} : vector<16x128xbf16>, vector<128x256xbf16>, vector<16x256xf32> -> vector<16x256xf32>
    %c0_76 = arith.constant 0 : index
    %c0_77 = arith.constant 0 : index
    %193 = vector.load %arg4[%c0_76, %c0_77] : memref<16x256xf32, #tpu.memory_space<vmem>>, vector<16x256xf32>
    tpu.vector_store %arg4[%c0_76, %c0_77], %192 {strides = array<i32>} : memref<16x256xf32, #tpu.memory_space<vmem>>, vector<16x256xf32>,
    return
  }
}

</mosaic_0001>

<bundles_post_ra>
// kernel: structured_resnet.1
= control target key start
LH: loop header
LB: loop body
LE: loop exit
PB: predicated region body
PF: predicated region fallthrough
CT: control target
= control target key end

     0   :  { %9 = vsyncpa [#allocation3], 0  ;;  %s1913_s0 = inlined_call_operand.vmem [shape: bf16[16,128], index: 0, kind: input, shape index: {}]   ;;  %s1914_s1 = inlined_call_operand.hbm [shape: bf16[896,128], index: 1, kind: input, shape index: {}]   ;;  %s1915_s2 = inlined_call_operand.vmem [shape: f32[16,128], index: 2, kind: input, shape index: {}]   ;;  %s1916_s3 = inlined_call_operand.hbm [shape: bf16[128,256], index: 3, kind: input, shape index: {}]   ;;  %s1917_s4 = inlined_call_operand.hbm [shape: f32[16,256], index: 4, kind: output, shape index: {}]  }
   0x1   :  { %10 = vsyncpa [#allocation6], 0 }
   0x2   :  { %11 = vsyncpa [#allocation4], 0  ;;  %s1699_s15 = smov [#allocation2]  }
   0x3   :  { %s19_s16 = sshll.u32 %s1699_s15, 4  ;;  %s20_s16 = int_to_ptr.vmem [resolvable:$true] %s19_s16 }
   0x4   :  { %s1641_s17 = scalar_lea.vmem %s20_s16, 7168  ;;  %p1646_p1 = scmp.lt.s32.totalorder %s20_s16, %s20_s16 }
   0x5   :  { %p1642_p0 = scmp.ne.s32.totalorder %s20_s16, %s1641_s17  ;;  %p1647_p2 = scmp.lt.s32.totalorder %s1641_s17, %s1641_s17 }
   0x7   :  { %p1648_p3 = por %p1647_p2, %p1646_p1 }
   0x9   :  { %p1649_p4 = pnand %p1648_p3, %p1642_p0 }
   0xb   :  { %1652 = shalt.err (!%p1649_p4)
}
   0xc   :  { %s1700_s18 = smov 64   ;;  %s1701_s19 = smov 4  }
   0xd   :  { %25 = dma.hbm_to_vmem [thread:$0]  %s1914_s1, 7168, %s20_s16, [#allocation3], %s1700_s18, %s1700_s18, %s1701_s19  }
   0xe   :  { %s1702_s22 = smov [#allocation5]  }
   0xf   :  { %s33_s23 = sshll.u32 %s1702_s22, 4  ;;  %s34_s23 = int_to_ptr.vmem [resolvable:$true] %s33_s23 }
  0x10   :  { %s1661_s24 = scalar_lea.vmem %s34_s23, 2048  ;;  %p1666_p6 = scmp.lt.s32.totalorder %s34_s23, %s34_s23 }
  0x11   :  { %p1662_p5 = scmp.ne.s32.totalorder %s34_s23, %s1661_s24  ;;  %p1667_p7 = scmp.lt.s32.totalorder %s1661_s24, %s1661_s24 }
  0x13   :  { %p1668_p8 = por %p1667_p7, %p1666_p6 }
  0x15   :  { %p1669_p9 = pnand %p1668_p8, %p1662_p5 }
  0x17   :  { %1672 = shalt.err (!%p1669_p9)
}
  0x18   :  { %s1703_s25 = smov 128   ;;  %s1704_s26 = smov 8  }
  0x19   :  { %39 = dma.hbm_to_vmem [thread:$0]  %s1916_s3, 2048, %s34_s23, [#allocation6], %s1703_s25, %s1703_s25, %s1704_s26  }
  0x1a   :  { %1693 = dma.done.wait [#allocation3], 7168  }
  0x1b   :  { %1694 = vsyncadd [#allocation3], 4294960128 }
  0x1c   :  { %1695 = dma.done.wait [#allocation6], 2048  }
  0x1d   :  { %1696 = vsyncadd [#allocation6], 4294965248  ;;  %v1705_v0 = vmov 0.0   ;;  %vm1706_vm0 = vmmov 0   ;;  %v1538_v1 = vld [vmem:[#allocation2 + $0x38] sm:$0xff]   ;;  %v1539_v2 = vld [vmem:[#allocation2 + $0x30] sm:$0xff]   ;;  %v186_v43 = vlaneseq }
  0x1e   :  { %1386 = vmatprep.subr.bf16.mxu0 %v1705_v0  ;;  %1402 = vmatprep.mubr.msk.bf16.mxu0 %vm1706_vm0, %v1705_v0  ;;  %v1540_v3 = vld [vmem:[#allocation2 + $0x28] sm:$0xff]   ;;  %v1541_v4 = vld [vmem:[#allocation2 + $0x20] sm:$0xff]   ;;  %v1542_v5 = vld [vmem:[#allocation2 + $0x18] sm:$0xff]  }
  0x1f   :  { %1406 = vmatprep.subr.bf16.mxu1 %v1705_v0  ;;  %1422 = vmatprep.mubr.msk.bf16.mxu1 %vm1706_vm0, %v1705_v0  ;;  %v1543_v6 = vld [vmem:[#allocation2 + $0x10] sm:$0xff]   ;;  %v1544_v7 = vld [vmem:[#allocation2 + $0x8] sm:$0xff]   ;;  %v1545_v8 = vld [vmem:[#allocation2] sm:$0xff]   ;;  %v187_v44 = vshrl.u32 %v186_v43, 7 }
  0x20   :  { %1387 = vmatpush3.bf16.msra.mxu0 %v1538_v1  ;;  %v1546_v9 = vld [vmem:[%s1913_s0] sm:$0xff]   ;;  %v1547_v10 = vld [vmem:[#allocation2 + $0x78] sm:$0xff]   ;;  %v1548_v11 = vld [vmem:[#allocation2 + $0x70] sm:$0xff]  }
  0x21   :  { %1388 = vmatprep.subr.bf16.mxu0 %v1705_v0  ;;  %1407 = vmatpush3.bf16.msra.mxu1 %v1547_v10  ;;  %v1549_v12 = vld [vmem:[#allocation2 + $0x68] sm:$0xff]   ;;  %v1550_v13 = vld [vmem:[#allocation2 + $0x60] sm:$0xff]   ;;  %v1551_v14 = vld [vmem:[#allocation2 + $0x58] sm:$0xff]   ;;  %v1773_v46 = vsub.s32 0, %v187_v44 }
  0x22   :  { %1408 = vmatprep.subr.bf16.mxu1 %v1705_v0  ;;  %v1552_v15 = vld [vmem:[#allocation2 + $0x50] sm:$0xff]   ;;  %v1553_v16 = vld [vmem:[#allocation2 + $0x48] sm:$0xff]   ;;  %v1554_v17 = vld [vmem:[#allocation2 + $0x40] sm:$0xff]  }
  0x23   :  { %v160_v45 = vld [vmem:[%s1915_s2] sm:$0x1]  ;;  %v1252_v50 = vld [vmem:[%s1915_s2 + $0x1] ss:$0 sm:$0xff]  ;;  %v1555_v58 = vld [vmem:[#allocation2 + $0xb8] sm:$0xff]  }
  0x24   :  { %1389 = vmatpush3.bf16.msra.mxu0 %v1539_v2  ;;  %v1556_v59 = vld [vmem:[#allocation2 + $0xb0] sm:$0xff]   ;;  %v1557_v60 = vld [vmem:[#allocation2 + $0xa8] sm:$0xff]   ;;  %v1558_v61 = vld [vmem:[#allocation2 + $0xa0] sm:$0xff]  }
  0x25   :  { %1390 = vmatprep.subr.bf16.mxu0 %v1705_v0  ;;  %1409 = vmatpush3.bf16.msra.mxu1 %v1548_v11  ;;  %v1559_v62 = vld [vmem:[#allocation2 + $0x98] sm:$0xff]   ;;  %v1560_v63 = vld [vmem:[#allocation2 + $0x90] sm:$0xff]   ;;  %v1561_v1 = vld [vmem:[#allocation2 + $0x88] sm:$0xff]  }
  0x26   :  { %1410 = vmatprep.subr.bf16.mxu1 %v1705_v0  ;;  %v1562_v2 = vld [vmem:[#allocation2 + $0x80] sm:$0xff]  }
  0x27   :  { %v1566_v44 = vld [vmem:[#allocation2 + $0xe0] sm:$0xff]  }
  0x28   :  { %1391 = vmatpush3.bf16.msra.mxu0 %v1540_v3 }
  0x29   :  { %1392 = vmatprep.subr.bf16.mxu0 %v1705_v0  ;;  %1411 = vmatpush3.bf16.msra.mxu1 %v1549_v12 }
  0x2a   :  { %1412 = vmatprep.subr.bf16.mxu1 %v1705_v0 }
  0x2c   :  { %1393 = vmatpush3.bf16.msra.mxu0 %v1541_v4 }
  0x2d   :  { %1394 = vmatprep.subr.bf16.mxu0 %v1705_v0  ;;  %1413 = vmatpush3.bf16.msra.mxu1 %v1550_v13 }
  0x2e   :  { %1414 = vmatprep.subr.bf16.mxu1 %v1705_v0 }
  0x30   :  { %1395 = vmatpush3.bf16.msra.mxu0 %v1542_v5 }
  0x31   :  { %1396 = vmatprep.subr.bf16.mxu0 %v1705_v0  ;;  %1415 = vmatpush3.bf16.msra.mxu1 %v1551_v14 }
  0x32   :  { %1416 = vmatprep.subr.bf16.mxu1 %v1705_v0 }
  0x34   :  { %1397 = vmatpush3.bf16.msra.mxu0 %v1543_v6 }
  0x35   :  { %1398 = vmatprep.subr.bf16.mxu0 %v1705_v0  ;;  %1417 = vmatpush3.bf16.msra.mxu1 %v1552_v15 }
  0x36   :  { %1418 = vmatprep.subr.bf16.mxu1 %v1705_v0 }
  0x38   :  { %1399 = vmatpush3.bf16.msra.mxu0 %v1544_v7 }
  0x39   :  { %1400 = vmatprep.subr.bf16.mxu0 %v1705_v0  ;;  %1419 = vmatpush3.bf16.msra.mxu1 %v1553_v16 }
  0x3a   :  { %1420 = vmatprep.subr.bf16.mxu1 %v1705_v0 }
  0x3c   :  { %1401 = vmatpush3.bf16.msra.mxu0 %v1545_v8 }
  0x3d   :  { %1426 = vmatprep.subr.bf16.mxu0 %v1705_v0  ;;  %1421 = vmatpush3.bf16.msra.mxu1 %v1554_v17 }
  0x3e   :  { %1446 = vmatprep.subr.bf16.mxu1 %v1705_v0 }
  0x3f   :  { %1403 = vmatmul.mubr.bf16.vlgmr.msra.gmra.mxu0 %v1546_v9 }
  0x40   :  { %1442 = vmatprep.mubr.msk.bf16.mxu0 %vm1706_vm0, %v1705_v0  ;;  %1427 = vmatpush3.bf16.msra.mxu0 %v1555_v58 }
  0x41   :  { %1428 = vmatprep.subr.bf16.mxu0 %v1705_v0 }
  0x44   :  { %1429 = vmatpush3.bf16.msra.mxu0 %v1556_v59 }
  0x45   :  { %1430 = vmatprep.subr.bf16.mxu0 %v1705_v0 }
  0x48   :  { %1431 = vmatpush3.bf16.msra.mxu0 %v1557_v60 }
  0x49   :  { %1432 = vmatprep.subr.bf16.mxu0 %v1705_v0 }
  0x4c   :  { %1433 = vmatpush3.bf16.msra.mxu0 %v1558_v61 }
  0x4d   :  { %1434 = vmatprep.subr.bf16.mxu0 %v1705_v0 }
  0x50   :  { %1435 = vmatpush3.bf16.msra.mxu0 %v1559_v62 }
  0x51   :  { %1436 = vmatprep.subr.bf16.mxu0 %v1705_v0 }
  0x54   :  { %1437 = vmatpush3.bf16.msra.mxu0 %v1560_v63 }
  0x55   :  { %1438 = vmatprep.subr.bf16.mxu0 %v1705_v0 }
  0x58   :  { %1439 = vmatpush3.bf16.msra.mxu0 %v1561_v1 }
  0x59   :  { %1440 = vmatprep.subr.bf16.mxu0 %v1705_v0 }
  0x5c   :  { %1441 = vmatpush3.bf16.msra.mxu0 %v1562_v2 }
  0x5d   :  { %1466 = vmatprep.subr.bf16.mxu0 %v1705_v0 }
  0xff   :  { %v153_v18 = vpop.f32.mrf.mxu0 }
 0x101   :  { %v1404_v19 = vpop.f32.mrf.mxu0 }
 0x103   :  { %v156_v20 = vpop.f32.mrf.mxu0 }
 0x104   :  { %v162_v21 = vadd.f32 %v156_v20, %v153_v18 }
 0x105   :  { %v1405_v22 = vpop.f32.mrf.mxu0 }
 0x106   :  { %v163_v23 = vrot.slane %v162_v21, 4 }
 0x108   :  { %v164_v24 = vadd.f32 %v163_v23, %v162_v21 }
 0x10a   :  { %v165_v25 = vrot.slane %v164_v24, 2 }
 0x10c   :  { %v166_v26 = vadd.f32 %v165_v25, %v164_v24 }
 0x10e   :  { %v167_v27 = vrot.slane %v166_v26, 1 }
 0x110   :  { %v168_v28 = vadd.f32 %v167_v27, %v166_v26 }
 0x112   :  { %v170_v29 = vmul.f32 0.0625, %v168_v28  ;;  %v306_v28 = vld [vmem:[%s1915_s2 + $0x2] sm:$0x1] }
 0x114   :  { %v171_v30 = vsub.f32 %v153_v18, %v170_v29  ;;  %v172_v31 = vsub.f32 %v156_v20, %v170_v29 }
 0x116   :  { %v173_v32 = vmul.f32 %v171_v30, %v171_v30  ;;  %v174_v33 = vmul.f32 %v172_v31, %v172_v31 }
 0x118   :  { %v175_v34 = vadd.f32 %v174_v33, %v173_v32  ;;  %v1261_v32 = vld [vmem:[%s1915_s2 + $0x3] ss:$0 sm:$0xff] }
 0x11a   :  { %v176_v35 = vrot.slane %v175_v34, 4 }
 0x11c   :  { %v177_v36 = vadd.f32 %v176_v35, %v175_v34 }
 0x11e   :  { %v178_v37 = vrot.slane %v177_v36, 2 }
 0x120   :  { %v179_v38 = vadd.f32 %v178_v37, %v177_v36 }
 0x122   :  { %v180_v39 = vrot.slane %v179_v38, 1 }
 0x124   :  { %v181_v40 = vadd.f32 %v180_v39, %v179_v38 }
 0x126   :  { %v182_v41 = vmul.f32 0.0625, %v181_v40  ;;  %v1563_v40 = vld [vmem:[#allocation2 + $0xf8] sm:$0xff]  }
 0x128   :  { %v183_v42 = vadd.f32 1e-05, %v182_v41  ;;  %v1564_v41 = vld [vmem:[#allocation2 + $0xf0] sm:$0xff]  }
 0x12a   :  { %1619 = vrsqrt.f32 %v183_v42  ;;  %v1565_v42 = vld [vmem:[#allocation2 + $0xe8] sm:$0xff]  }
 0x137   :  { %v1620_v47 = vpop.eup %1619 }
 0x138   :  { %v185_v48 = vmul.f32 %v1620_v47, %v160_v45  ;;  %v1567_v45 = vld [vmem:[#allocation2 + $0xd8] sm:$0xff]   ;;  %v1568_v47 = vld [vmem:[#allocation2 + $0xd0] sm:$0xff]  }
 0x13a   :  { %v189_v49 = vrot.slane %v185_v48, %v1773_v46  ;;  %v1569_v48 = vld [vmem:[#allocation2 + $0xc8] sm:$0xff]  }
 0x13c   :  { %v190_v51 = vmul.f32 %v189_v49, %v171_v30  ;;  %v191_v52 = vmul.f32 %v189_v49, %v172_v31  ;;  %v1570_v49 = vld [vmem:[#allocation2 + $0xc0] sm:$0xff]  }
 0x13e   :  { %v1779_v53 = vadd.f32 %v1252_v50, %v191_v52  ;;  %v1781_v54 = vadd.f32 %v1252_v50, %v190_v51 }
 0x140   :  { %v198_v55 = vmax.f32 %v1781_v54, 0.0  ;;  %v199_v56 = vmax.f32 %v1779_v53, 0.0  ;;  %v1571_v54 = vld [vmem:[#allocation2 + $0x138] sm:$0xff]   ;;  %v1572_v53 = vld [vmem:[#allocation2 + $0x130] sm:$0xff]  }
 0x142   :  { %v200_v57 = vpack.c.bf16 %v199_v56, %v198_v55 }
 0x144   :  { %1423 = vmatmul.mubr.bf16.vlgmr.msra.gmra.mxu1 %v200_v57 }
 0x145   :  { %1462 = vmatprep.mubr.msk.bf16.mxu1 %vm1706_vm0, %v1705_v0  ;;  %1447 = vmatpush3.bf16.msra.mxu1 %v1563_v40 }
 0x146   :  { %1448 = vmatprep.subr.bf16.mxu1 %v1705_v0 }
 0x149   :  { %1449 = vmatpush3.bf16.msra.mxu1 %v1564_v41 }
 0x14a   :  { %1450 = vmatprep.subr.bf16.mxu1 %v1705_v0 }
 0x14d   :  { %1451 = vmatpush3.bf16.msra.mxu1 %v1565_v42 }
 0x14e   :  { %1452 = vmatprep.subr.bf16.mxu1 %v1705_v0 }
 0x151   :  { %1453 = vmatpush3.bf16.msra.mxu1 %v1566_v44 }
 0x152   :  { %1454 = vmatprep.subr.bf16.mxu1 %v1705_v0 }
 0x155   :  { %1455 = vmatpush3.bf16.msra.mxu1 %v1567_v45 }
 0x156   :  { %1456 = vmatprep.subr.bf16.mxu1 %v1705_v0 }
 0x159   :  { %1457 = vmatpush3.bf16.msra.mxu1 %v1568_v47 }
 0x15a   :  { %1458 = vmatprep.subr.bf16.mxu1 %v1705_v0 }
 0x15d   :  { %1459 = vmatpush3.bf16.msra.mxu1 %v1569_v48 }
 0x15e   :  { %1460 = vmatprep.subr.bf16.mxu1 %v1705_v0 }
 0x161   :  { %1461 = vmatpush3.bf16.msra.mxu1 %v1570_v49 }
 0x162   :  { %1486 = vmatprep.subr.bf16.mxu1 %v1705_v0 }
 0x204   :  { %v299_v3 = vpop.f32.mrf.mxu1 }
 0x206   :  { %v1424_v4 = vpop.f32.mrf.mxu1 }
 0x208   :  { %v302_v5 = vpop.f32.mrf.mxu1 }
 0x209   :  { %v308_v6 = vadd.f32 %v302_v5, %v299_v3 }
 0x20a   :  { %v1425_v7 = vpop.f32.mrf.mxu1 }
 0x20b   :  { %v309_v8 = vrot.slane %v308_v6, 4 }
 0x20d   :  { %v310_v9 = vadd.f32 %v309_v8, %v308_v6 }
 0x20f   :  { %v311_v10 = vrot.slane %v310_v9, 2 }
 0x211   :  { %v312_v11 = vadd.f32 %v311_v10, %v310_v9 }
 0x213   :  { %v313_v12 = vrot.slane %v312_v11, 1 }
 0x215   :  { %v314_v13 = vadd.f32 %v313_v12, %v312_v11 }
 0x217   :  { %v315_v14 = vmul.f32 0.0625, %v314_v13 }
 0x219   :  { %v316_v15 = vsub.f32 %v299_v3, %v315_v14  ;;  %v317_v16 = vsub.f32 %v302_v5, %v315_v14 }
 0x21b   :  { %v318_v17 = vmul.f32 %v316_v15, %v316_v15  ;;  %v319_v18 = vmul.f32 %v317_v16, %v317_v16 }
 0x21d   :  { %v320_v19 = vadd.f32 %v319_v18, %v318_v17 }
 0x21f   :  { %v321_v20 = vrot.slane %v320_v19, 4 }
 0x221   :  { %v322_v21 = vadd.f32 %v321_v20, %v320_v19  ;;  %v1270_v20 = vld [vmem:[%s1915_s2 + $0x5] ss:$0 sm:$0xff] }
 0x223   :  { %v323_v22 = vrot.slane %v322_v21, 2 }
 0x225   :  { %v324_v23 = vadd.f32 %v323_v22, %v322_v21 }
 0x227   :  { %v325_v24 = vrot.slane %v324_v23, 1 }
 0x229   :  { %v326_v25 = vadd.f32 %v325_v24, %v324_v23 }
 0x22b   :  { %v327_v26 = vmul.f32 0.0625, %v326_v25 }
 0x22d   :  { %v328_v27 = vadd.f32 1e-05, %v327_v26 }
 0x22f   :  { %1621 = vrsqrt.f32 %v328_v27 }
 0x23c   :  { %v1622_v29 = vpop.eup %1621 }
 0x23d   :  { %v330_v30 = vmul.f32 %v1622_v29, %v306_v28 }
 0x23f   :  { %v334_v31 = vrot.slane %v330_v30, %v1773_v46  ;;  %v1575_v30 = vld [vmem:[#allocation2 + $0x118] sm:$0xff]  }
 0x241   :  { %v335_v33 = vmul.f32 %v334_v31, %v316_v15  ;;  %v336_v34 = vmul.f32 %v334_v31, %v317_v16  ;;  %v451_v16 = vld [vmem:[%s1915_s2 + $0x4] sm:$0x1]  ;;  %v1576_v31 = vld [vmem:[#allocation2 + $0x110] sm:$0xff]  }
 0x243   :  { %v341_v35 = vadd.f32 %v1261_v32, %v335_v33  ;;  %v342_v36 = vadd.f32 %v1261_v32, %v336_v34  ;;  %v1577_v32 = vld [vmem:[#allocation2 + $0x108] sm:$0xff]   ;;  %v1578_v33 = vld [vmem:[#allocation2 + $0x100] sm:$0xff]  }
 0x245   :  { %v343_v37 = vmax.f32 %v341_v35, 0.0  ;;  %v344_v38 = vmax.f32 %v342_v36, 0.0 }
 0x247   :  { %v345_v39 = vpack.c.bf16 %v344_v38, %v343_v37 }
 0x249   :  { %1443 = vmatmul.mubr.bf16.vlgmr.msra.gmra.mxu0 %v345_v39 }
 0x24a   :  { %1482 = vmatprep.mubr.msk.bf16.mxu0 %vm1706_vm0, %v1705_v0  ;;  %1467 = vmatpush3.bf16.msra.mxu0 %v1571_v54 }
 0x24b   :  { %1468 = vmatprep.subr.bf16.mxu0 %v1705_v0 }
 0x24e   :  { %1469 = vmatpush3.bf16.msra.mxu0 %v1572_v53 }
 0x24f   :  { %1470 = vmatprep.subr.bf16.mxu0 %v1705_v0 }
 0x309   :  { %v444_v50 = vpop.f32.mrf.mxu0 }
 0x30b   :  { %v1444_v51 = vpop.f32.mrf.mxu0 }
 0x30d   :  { %v447_v52 = vpop.f32.mrf.mxu0 }
 0x30e   :  { %v453_v57 = vadd.f32 %v447_v52, %v444_v50 }
 0x30f   :  { %v1445_v58 = vpop.f32.mrf.mxu0 }
 0x310   :  { %v454_v59 = vrot.slane %v453_v57, 4 }
 0x312   :  { %v455_v60 = vadd.f32 %v454_v59, %v453_v57 }
 0x314   :  { %v456_v61 = vrot.slane %v455_v60, 2 }
 0x316   :  { %v457_v62 = vadd.f32 %v456_v61, %v455_v60 }
 0x318   :  { %v458_v63 = vrot.slane %v457_v62, 1 }
 0x31a   :  { %v459_v1 = vadd.f32 %v458_v63, %v457_v62 }
 0x31c   :  { %v460_v2 = vmul.f32 0.0625, %v459_v1 }
 0x31e   :  { %v461_v3 = vsub.f32 %v444_v50, %v460_v2  ;;  %v462_v4 = vsub.f32 %v447_v52, %v460_v2  ;;  %v598_v2 = vld [vmem:[%s1915_s2 + $0x6] sm:$0x1] }
 0x320   :  { %v463_v5 = vmul.f32 %v461_v3, %v461_v3  ;;  %v464_v6 = vmul.f32 %v462_v4, %v462_v4 }
 0x322   :  { %v465_v7 = vadd.f32 %v464_v6, %v463_v5  ;;  %v1279_v6 = vld [vmem:[%s1915_s2 + $0x7] ss:$0 sm:$0xff] }
 0x324   :  { %v466_v8 = vrot.slane %v465_v7, 4 }
 0x326   :  { %v467_v9 = vadd.f32 %v466_v8, %v465_v7 }
 0x328   :  { %v468_v10 = vrot.slane %v467_v9, 2 }
 0x32a   :  { %v469_v11 = vadd.f32 %v468_v10, %v467_v9 }
 0x32c   :  { %v470_v12 = vrot.slane %v469_v11, 1 }
 0x32e   :  { %v471_v13 = vadd.f32 %v470_v12, %v469_v11 }
 0x330   :  { %v472_v14 = vmul.f32 0.0625, %v471_v13 }
 0x332   :  { %v473_v15 = vadd.f32 1e-05, %v472_v14  ;;  %v1579_v14 = vld [vmem:[#allocation2 + $0x178] sm:$0xff]  }
 0x334   :  { %1623 = vrsqrt.f32 %v473_v15  ;;  %v1580_v15 = vld [vmem:[#allocation2 + $0x170] sm:$0xff]  }
 0x341   :  { %v1624_v17 = vpop.eup %1623 }
 0x342   :  { %v475_v18 = vmul.f32 %v1624_v17, %v451_v16  ;;  %v1581_v16 = vld [vmem:[#allocation2 + $0x168] sm:$0xff]   ;;  %v1582_v17 = vld [vmem:[#allocation2 + $0x160] sm:$0xff]  }
 0x344   :  { %v479_v19 = vrot.slane %v475_v18, %v1773_v46  ;;  %v1583_v18 = vld [vmem:[#allocation2 + $0x158] sm:$0xff]  }
 0x346   :  { %v480_v21 = vmul.f32 %v479_v19, %v461_v3  ;;  %v481_v22 = vmul.f32 %v479_v19, %v462_v4  ;;  %v1584_v19 = vld [vmem:[#allocation2 + $0x150] sm:$0xff]  }
 0x348   :  { %v486_v23 = vadd.f32 %v1270_v20, %v480_v21  ;;  %v487_v24 = vadd.f32 %v1270_v20, %v481_v22  ;;  %v1585_v20 = vld [vmem:[#allocation2 + $0x148] sm:$0xff]   ;;  %v1586_v21 = vld [vmem:[#allocation2 + $0x140] sm:$0xff]  }
 0x34a   :  { %v1825_v25 = vadd.f32 %v486_v23, %v198_v55  ;;  %v1829_v26 = vadd.f32 %v487_v24, %v199_v56  ;;  %v1573_v55 = vld [vmem:[#allocation2 + $0x128] sm:$0xff]   ;;  %v1574_v56 = vld [vmem:[#allocation2 + $0x120] sm:$0xff]  }
 0x34b   :  { %1471 = vmatpush3.bf16.msra.mxu0 %v1573_v55 }
 0x34c   :  { %v491_v27 = vmax.f32 %v1829_v26, 0.0  ;;  %v490_v28 = vmax.f32 %v1825_v25, 0.0  ;;  %1472 = vmatprep.subr.bf16.mxu0 %v1705_v0  ;;  %v1588_v25 = vld [vmem:[#allocation2 + $0x1b0] sm:$0xff]   ;;  %v1589_v26 = vld [vmem:[#allocation2 + $0x1a8] sm:$0xff]  }
 0x34e   :  { %v492_v29 = vpack.c.bf16 %v491_v27, %v490_v28 }
 0x34f   :  { %1473 = vmatpush3.bf16.msra.mxu0 %v1574_v56 }
 0x350   :  { %1463 = vmatmul.mubr.bf16.vlgmr.msra.gmra.mxu1 %v492_v29  ;;  %1474 = vmatprep.subr.bf16.mxu0 %v1705_v0 }
 0x351   :  { %1502 = vmatprep.mubr.msk.bf16.mxu1 %vm1706_vm0, %v1705_v0  ;;  %1487 = vmatpush3.bf16.msra.mxu1 %v1579_v14 }
 0x352   :  { %1488 = vmatprep.subr.bf16.mxu1 %v1705_v0 }
 0x353   :  { %1475 = vmatpush3.bf16.msra.mxu0 %v1575_v30 }
 0x354   :  { %1476 = vmatprep.subr.bf16.mxu0 %v1705_v0 }
 0x355   :  { %1489 = vmatpush3.bf16.msra.mxu1 %v1580_v15 }
 0x356   :  { %1490 = vmatprep.subr.bf16.mxu1 %v1705_v0 }
 0x357   :  { %1477 = vmatpush3.bf16.msra.mxu0 %v1576_v31 }
 0x358   :  { %1478 = vmatprep.subr.bf16.mxu0 %v1705_v0 }
 0x359   :  { %1491 = vmatpush3.bf16.msra.mxu1 %v1581_v16 }
 0x35a   :  { %1492 = vmatprep.subr.bf16.mxu1 %v1705_v0 }
 0x35b   :  { %1479 = vmatpush3.bf16.msra.mxu0 %v1577_v32 }
 0x35c   :  { %1480 = vmatprep.subr.bf16.mxu0 %v1705_v0 }
 0x35d   :  { %1493 = vmatpush3.bf16.msra.mxu1 %v1582_v17 }
 0x35e   :  { %1494 = vmatprep.subr.bf16.mxu1 %v1705_v0 }
 0x35f   :  { %1481 = vmatpush3.bf16.msra.mxu0 %v1578_v33 }
 0x360   :  { %1506 = vmatprep.subr.bf16.mxu0 %v1705_v0 }
 0x361   :  { %1495 = vmatpush3.bf16.msra.mxu1 %v1583_v18 }
 0x362   :  { %1496 = vmatprep.subr.bf16.mxu1 %v1705_v0 }
 0x365   :  { %1497 = vmatpush3.bf16.msra.mxu1 %v1584_v19 }
 0x366   :  { %1498 = vmatprep.subr.bf16.mxu1 %v1705_v0 }
 0x369   :  { %1499 = vmatpush3.bf16.msra.mxu1 %v1585_v20 }
 0x36a   :  { %1500 = vmatprep.subr.bf16.mxu1 %v1705_v0 }
 0x36d   :  { %1501 = vmatpush3.bf16.msra.mxu1 %v1586_v21 }
 0x410   :  { %v591_v34 = vpop.f32.mrf.mxu1 }
 0x412   :  { %v1464_v35 = vpop.f32.mrf.mxu1 }
 0x414   :  { %v594_v36 = vpop.f32.mrf.mxu1 }
 0x415   :  { %v600_v37 = vadd.f32 %v594_v36, %v591_v34 }
 0x416   :  { %v1465_v38 = vpop.f32.mrf.mxu1 }
 0x417   :  { %v601_v39 = vrot.slane %v600_v37, 4 }
 0x419   :  { %v602_v40 = vadd.f32 %v601_v39, %v600_v37 }
 0x41b   :  { %v603_v41 = vrot.slane %v602_v40, 2 }
 0x41d   :  { %v604_v42 = vadd.f32 %v603_v41, %v602_v40 }
 0x41f   :  { %v605_v44 = vrot.slane %v604_v42, 1 }
 0x421   :  { %v606_v45 = vadd.f32 %v605_v44, %v604_v42 }
 0x423   :  { %v607_v47 = vmul.f32 0.0625, %v606_v45 }
 0x425   :  { %v608_v48 = vsub.f32 %v591_v34, %v607_v47  ;;  %v609_v49 = vsub.f32 %v594_v36, %v607_v47 }
 0x427   :  { %v610_v50 = vmul.f32 %v608_v48, %v608_v48  ;;  %v611_v51 = vmul.f32 %v609_v49, %v609_v49 }
 0x429   :  { %v612_v52 = vadd.f32 %v611_v51, %v610_v50 }
 0x42b   :  { %v613_v57 = vrot.slane %v612_v52, 4 }
 0x42d   :  { %v614_v58 = vadd.f32 %v613_v57, %v612_v52  ;;  %v1288_v57 = vld [vmem:[%s1915_s2 + $0x9] ss:$0 sm:$0xff] }
 0x42f   :  { %v615_v59 = vrot.slane %v614_v58, 2 }
 0x431   :  { %v616_v60 = vadd.f32 %v615_v59, %v614_v58 }
 0x433   :  { %v617_v61 = vrot.slane %v616_v60, 1 }
 0x435   :  { %v618_v62 = vadd.f32 %v617_v61, %v616_v60 }
 0x437   :  { %v619_v63 = vmul.f32 0.0625, %v618_v62 }
 0x439   :  { %v620_v1 = vadd.f32 1e-05, %v619_v63 }
 0x43b   :  { %1625 = vrsqrt.f32 %v620_v1 }
 0x448   :  { %v1626_v3 = vpop.eup %1625 }
 0x449   :  { %v622_v4 = vmul.f32 %v1626_v3, %v598_v2 }
 0x44b   :  { %v626_v5 = vrot.slane %v622_v4, %v1773_v46  ;;  %v1587_v4 = vld [vmem:[#allocation2 + $0x1b8] sm:$0xff]  }
 0x44d   :  { %v627_v7 = vmul.f32 %v626_v5, %v608_v48  ;;  %v628_v8 = vmul.f32 %v626_v5, %v609_v49  ;;  %v743_v49 = vld [vmem:[%s1915_s2 + $0x8] sm:$0x1]  ;;  %v1592_v5 = vld [vmem:[#allocation2 + $0x190] sm:$0xff]  }
 0x44f   :  { %v633_v9 = vadd.f32 %v1279_v6, %v627_v7  ;;  %v634_v10 = vadd.f32 %v1279_v6, %v628_v8  ;;  %v1593_v6 = vld [vmem:[#allocation2 + $0x188] sm:$0xff]   ;;  %v1594_v7 = vld [vmem:[#allocation2 + $0x180] sm:$0xff]  }
 0x451   :  { %v635_v11 = vmax.f32 %v633_v9, 0.0  ;;  %v636_v12 = vmax.f32 %v634_v10, 0.0 }
 0x453   :  { %v637_v13 = vpack.c.bf16 %v636_v12, %v635_v11 }
 0x455   :  { %1483 = vmatmul.mubr.bf16.vlgmr.msra.gmra.mxu0 %v637_v13 }
 0x456   :  { %1522 = vmatprep.mubr.msk.bf16.mxu0 %vm1706_vm0, %v1705_v0  ;;  %1507 = vmatpush3.bf16.msra.mxu0 %v1587_v4  ;;  %v1613_v4 = vld [vmem:[#allocation5 + $0x10] ss:$8 sps:$4 sm:$0xff]  }
 0x457   :  { %1508 = vmatprep.subr.bf16.mxu0 %v1705_v0 }
 0x45a   :  { %1509 = vmatpush3.bf16.msra.mxu0 %v1588_v25  ;;  %v1618_v25 = vld [vmem:[#allocation5 + $0x4] ss:$8 sps:$4 sm:$0xff]  }
 0x45b   :  { %1510 = vmatprep.subr.bf16.mxu0 %v1705_v0 }
 0x45e   :  { %1511 = vmatpush3.bf16.msra.mxu0 %v1589_v26  ;;  %v1616_v26 = vld [vmem:[#allocation5] ss:$8 sps:$4 sm:$0xff]  }
 0x45f   :  { %1512 = vmatprep.subr.bf16.mxu0 %v1705_v0 }
 0x515   :  { %v736_v22 = vpop.f32.mrf.mxu0 }
 0x517   :  { %v1484_v23 = vpop.f32.mrf.mxu0 }
 0x519   :  { %v739_v24 = vpop.f32.mrf.mxu0 }
 0x51a   :  { %v745_v29 = vadd.f32 %v739_v24, %v736_v22 }
 0x51b   :  { %v1485_v54 = vpop.f32.mrf.mxu0 }
 0x51c   :  { %v746_v53 = vrot.slane %v745_v29, 4 }
 0x51e   :  { %v747_v55 = vadd.f32 %v746_v53, %v745_v29 }
 0x520   :  { %v748_v56 = vrot.slane %v747_v55, 2 }
 0x522   :  { %v749_v30 = vadd.f32 %v748_v56, %v747_v55 }
 0x524   :  { %v750_v31 = vrot.slane %v749_v30, 1 }
 0x526   :  { %v751_v32 = vadd.f32 %v750_v31, %v749_v30 }
 0x528   :  { %v752_v33 = vmul.f32 0.0625, %v751_v32  ;;  %v890_v32 = vld [vmem:[%s1915_s2 + $0xa] sm:$0x1] }
 0x52a   :  { %v753_v34 = vsub.f32 %v736_v22, %v752_v33  ;;  %v754_v35 = vsub.f32 %v739_v24, %v752_v33 }
 0x52c   :  { %v755_v36 = vmul.f32 %v753_v34, %v753_v34  ;;  %v756_v37 = vmul.f32 %v754_v35, %v754_v35 }
 0x52e   :  { %v757_v38 = vadd.f32 %v756_v37, %v755_v36  ;;  %v1297_v36 = vld [vmem:[%s1915_s2 + $0xb] ss:$0 sm:$0xff] }
 0x530   :  { %v758_v39 = vrot.slane %v757_v38, 4 }
 0x532   :  { %v759_v40 = vadd.f32 %v758_v39, %v757_v38 }
 0x534   :  { %v760_v41 = vrot.slane %v759_v40, 2 }
 0x536   :  { %v761_v42 = vadd.f32 %v760_v41, %v759_v40 }
 0x538   :  { %v762_v44 = vrot.slane %v761_v42, 1 }
 0x53a   :  { %v763_v45 = vadd.f32 %v762_v44, %v761_v42 }
 0x53c   :  { %v764_v47 = vmul.f32 0.0625, %v763_v45  ;;  %v1597_v45 = vld [vmem:[#allocation5 + $0x74] ss:$8 sps:$4 sm:$0xff]  }
 0x53d   :  { %1178 = vmatprep.subr.bf16.mxu1 %v1597_v45 }
 0x53e   :  { %v765_v48 = vadd.f32 1e-05, %v764_v47  ;;  %v1595_v47 = vld [vmem:[#allocation5 + $0x70] ss:$8 sps:$4 sm:$0xff]  }
 0x540   :  { %1627 = vrsqrt.f32 %v765_v48  ;;  %v1600_v48 = vld [vmem:[#allocation5 + $0x64] ss:$8 sps:$4 sm:$0xff]  }
 0x54d   :  { %v1628_v50 = vpop.eup %1627 }
 0x54e   :  { %v767_v51 = vmul.f32 %v1628_v50, %v743_v49  ;;  %v1598_v49 = vld [vmem:[#allocation5 + $0x60] ss:$8 sps:$4 sm:$0xff]   ;;  %v1603_v50 = vld [vmem:[#allocation5 + $0x54] ss:$8 sps:$4 sm:$0xff]  }
 0x550   :  { %v771_v52 = vrot.slane %v767_v51, %v1773_v46  ;;  %v1601_v51 = vld [vmem:[#allocation5 + $0x50] ss:$8 sps:$4 sm:$0xff]  }
 0x552   :  { %v772_v58 = vmul.f32 %v771_v52, %v753_v34  ;;  %v773_v59 = vmul.f32 %v771_v52, %v754_v35  ;;  %v1606_v52 = vld [vmem:[#allocation5 + $0x44] ss:$8 sps:$4 sm:$0xff]  }
 0x554   :  { %v778_v60 = vadd.f32 %v1288_v57, %v772_v58  ;;  %v779_v61 = vadd.f32 %v1288_v57, %v773_v59  ;;  %v1604_v57 = vld [vmem:[#allocation5 + $0x40] ss:$8 sps:$4 sm:$0xff]   ;;  %v1609_v58 = vld [vmem:[#allocation5 + $0x34] ss:$8 sps:$4 sm:$0xff]   ;;  %v1607_v59 = vld [vmem:[#allocation5 + $0x30] ss:$8 sps:$4 sm:$0xff]  }
 0x556   :  { %v1872_v62 = vadd.f32 %v778_v60, %v490_v28  ;;  %v1876_v63 = vadd.f32 %v779_v61, %v491_v27  ;;  %v1590_v27 = vld [vmem:[#allocation2 + $0x1a0] sm:$0xff]   ;;  %v1591_v28 = vld [vmem:[#allocation2 + $0x198] sm:$0xff]  }
 0x557   :  { %1513 = vmatpush3.bf16.msra.mxu0 %v1590_v27  ;;  %v1612_v60 = vld [vmem:[#allocation5 + $0x24] ss:$8 sps:$4 sm:$0xff]   ;;  %v1610_v61 = vld [vmem:[#allocation5 + $0x20] ss:$8 sps:$4 sm:$0xff]   ;;  %v1707_v27 = vmov 0  }
 0x558   :  { %v783_v1 = vmax.f32 %v1876_v63, 0.0  ;;  %v782_v2 = vmax.f32 %v1872_v62, 0.0  ;;  %1514 = vmatprep.subr.bf16.mxu0 %v1705_v0 }
 0x55a   :  { %v784_v3 = vpack.c.bf16 %v783_v1, %v782_v2 }
 0x55b   :  { %1515 = vmatpush3.bf16.msra.mxu0 %v1591_v28 }
 0x55c   :  { %1503 = vmatmul.mubr.bf16.vlgmr.msra.gmra.mxu1 %v784_v3  ;;  %1516 = vmatprep.subr.bf16.mxu0 %v1705_v0  ;;  %v1615_v3 = vld [vmem:[#allocation5 + $0x14] ss:$8 sps:$4 sm:$0xff]  }
 0x55d   :  { %1179 = vmatpush1.bf16.msra.mxu1 %v1595_v47  ;;  %1210 = vmatprep.mubr.bf16.mxu1 %v1707_v27 }
 0x55e   :  { %1180 = vmatprep.subr.bf16.mxu1 %v1600_v48 }
 0x55f   :  { %1517 = vmatpush3.bf16.msra.mxu0 %v1592_v5 }
 0x560   :  { %1518 = vmatprep.subr.bf16.mxu0 %v1705_v0 }
 0x561   :  { %1181 = vmatpush1.bf16.msra.mxu1 %v1598_v49 }
 0x562   :  { %1182 = vmatprep.subr.bf16.mxu1 %v1603_v50 }
 0x563   :  { %1519 = vmatpush3.bf16.msra.mxu0 %v1593_v6 }
 0x564   :  { %1520 = vmatprep.subr.bf16.mxu0 %v1705_v0 }
 0x565   :  { %1183 = vmatpush1.bf16.msra.mxu1 %v1601_v51 }
 0x566   :  { %1184 = vmatprep.subr.bf16.mxu1 %v1606_v52 }
 0x567   :  { %1521 = vmatpush3.bf16.msra.mxu0 %v1594_v7 }
 0x569   :  { %1185 = vmatpush1.bf16.msra.mxu1 %v1604_v57 }
 0x56a   :  { %1186 = vmatprep.subr.bf16.mxu1 %v1609_v58 }
 0x56d   :  { %1187 = vmatpush1.bf16.msra.mxu1 %v1607_v59 }
 0x56e   :  { %1188 = vmatprep.subr.bf16.mxu1 %v1612_v60 }
 0x571   :  { %1189 = vmatpush1.bf16.msra.mxu1 %v1610_v61 }
 0x572   :  { %1190 = vmatprep.subr.bf16.mxu1 %v1615_v3 }
 0x575   :  { %1191 = vmatpush1.bf16.msra.mxu1 %v1613_v4 }
 0x576   :  { %1192 = vmatprep.subr.bf16.mxu1 %v1618_v25 }
 0x579   :  { %1193 = vmatpush1.bf16.msra.mxu1 %v1616_v26 }
 0x61c   :  { %v883_v8 = vpop.f32.mrf.mxu1 }
 0x61e   :  { %v1504_v9 = vpop.f32.mrf.mxu1 }
 0x620   :  { %v886_v10 = vpop.f32.mrf.mxu1 }
 0x621   :  { %v892_v11 = vadd.f32 %v886_v10, %v883_v8 }
 0x622   :  { %v1505_v12 = vpop.f32.mrf.mxu1 }
 0x623   :  { %v893_v13 = vrot.slane %v892_v11, 4 }
 0x625   :  { %v894_v14 = vadd.f32 %v893_v13, %v892_v11 }
 0x627   :  { %v895_v15 = vrot.slane %v894_v14, 2 }
 0x629   :  { %v896_v16 = vadd.f32 %v895_v15, %v894_v14 }
 0x62b   :  { %v897_v17 = vrot.slane %v896_v16, 1 }
 0x62d   :  { %v898_v18 = vadd.f32 %v897_v17, %v896_v16 }
 0x62f   :  { %v899_v19 = vmul.f32 0.0625, %v898_v18 }
 0x631   :  { %v900_v20 = vsub.f32 %v883_v8, %v899_v19  ;;  %v901_v21 = vsub.f32 %v886_v10, %v899_v19 }
 0x633   :  { %v902_v22 = vmul.f32 %v900_v20, %v900_v20  ;;  %v903_v23 = vmul.f32 %v901_v21, %v901_v21 }
 0x635   :  { %v904_v24 = vadd.f32 %v903_v23, %v902_v22 }
 0x637   :  { %v905_v0 = vrot.slane %v904_v24, 4 }
 0x639   :  { %v906_v29 = vadd.f32 %v905_v0, %v904_v24 }
 0x63b   :  { %v907_v54 = vrot.slane %v906_v29, 2 }
 0x63d   :  { %v908_v53 = vadd.f32 %v907_v54, %v906_v29 }
 0x63f   :  { %v909_v55 = vrot.slane %v908_v53, 1 }
 0x641   :  { %v910_v56 = vadd.f32 %v909_v55, %v908_v53  ;;  %v1035_v55 = vld [vmem:[%s1915_s2 + $0xc] sm:$0x1] }
 0x643   :  { %v911_v30 = vmul.f32 0.0625, %v910_v56 }
 0x645   :  { %v912_v31 = vadd.f32 1e-05, %v911_v30 }
 0x647   :  { %1629 = vrsqrt.f32 %v912_v31 }
 0x654   :  { %v1630_v33 = vpop.eup %1629 }
 0x655   :  { %v914_v34 = vmul.f32 %v1630_v33, %v890_v32  ;;  %v1306_v32 = vld [vmem:[%s1915_s2 + $0xd] ss:$0 sm:$0xff]  ;;  %s1708_s2 = smov [#allocation7]  }
 0x656   :  { %s1230_s3 = sshll.u32 %s1708_s2, 4  ;;  %s1231_s3 = int_to_ptr.vmem [resolvable:$true] %s1230_s3 }
 0x657   :  { %v918_v35 = vrot.slane %v914_v34, %v1773_v46  ;;  %s1673_s0 = scalar_lea.vmem %s1231_s3, 512  ;;  %p1678_p11 = scmp.lt.s32.totalorder %s1231_s3, %s1231_s3 }
 0x658   :  { %p1674_p10 = scmp.ne.s32.totalorder %s1231_s3, %s1673_s0  ;;  %p1679_p12 = scmp.lt.s32.totalorder %s1673_s0, %s1673_s0 }
 0x659   :  { %v919_v37 = vmul.f32 %v918_v35, %v900_v20  ;;  %v920_v38 = vmul.f32 %v918_v35, %v901_v21  ;;  %v1077_v35 = vand.u32 127, %v186_v43 }
 0x65a   :  { %p1680_p13 = por %p1679_p12, %p1678_p11 }
 0x65b   :  { %v925_v39 = vadd.f32 %v1297_v36, %v919_v37  ;;  %v926_v40 = vadd.f32 %v1297_v36, %v920_v38  ;;  %vm1078_vm1 = vcmp.eq.s32.totalorder %v1077_v35, 64 }
 0x65c   :  { %p1681_p0 = pnand %p1680_p13, %p1674_p10 }
 0x65d   :  { %v927_v41 = vmax.f32 %v925_v39, 0.0  ;;  %v928_v42 = vmax.f32 %v926_v40, 0.0 }
 0x65f   :  { %v929_v44 = vpack.c.bf16 %v928_v42, %v927_v41 }
 0x661   :  { %1523 = vmatmul.mubr.bf16.vlgmr.msra.gmra.mxu0 %v929_v44 }
 0x721   :  { %v1028_v28 = vpop.f32.mrf.mxu0 }
 0x723   :  { %v1524_v5 = vpop.f32.mrf.mxu0 }
 0x725   :  { %v1031_v6 = vpop.f32.mrf.mxu0 }
 0x726   :  { %v1037_v7 = vadd.f32 %v1031_v6, %v1028_v28 }
 0x727   :  { %v1525_v8 = vpop.f32.mrf.mxu0 }
 0x728   :  { %v1038_v9 = vrot.slane %v1037_v7, 4 }
 0x72a   :  { %v1039_v10 = vadd.f32 %v1038_v9, %v1037_v7 }
 0x72c   :  { %v1040_v11 = vrot.slane %v1039_v10, 2 }
 0x72e   :  { %v1041_v12 = vadd.f32 %v1040_v11, %v1039_v10 }
 0x730   :  { %v1042_v13 = vrot.slane %v1041_v12, 1 }
 0x732   :  { %v1043_v14 = vadd.f32 %v1042_v13, %v1041_v12 }
 0x734   :  { %v1044_v15 = vmul.f32 0.0625, %v1043_v14 }
 0x736   :  { %v1045_v16 = vsub.f32 %v1028_v28, %v1044_v15  ;;  %v1046_v17 = vsub.f32 %v1031_v6, %v1044_v15 }
 0x738   :  { %v1047_v18 = vmul.f32 %v1045_v16, %v1045_v16  ;;  %v1048_v19 = vmul.f32 %v1046_v17, %v1046_v17 }
 0x73a   :  { %v1049_v20 = vadd.f32 %v1048_v19, %v1047_v18 }
 0x73c   :  { %v1050_v21 = vrot.slane %v1049_v20, 4 }
 0x73e   :  { %v1051_v22 = vadd.f32 %v1050_v21, %v1049_v20 }
 0x740   :  { %v1052_v23 = vrot.slane %v1051_v22, 2 }
 0x742   :  { %v1053_v24 = vadd.f32 %v1052_v23, %v1051_v22 }
 0x744   :  { %v1054_v0 = vrot.slane %v1053_v24, 1 }
 0x746   :  { %v1055_v29 = vadd.f32 %v1054_v0, %v1053_v24 }
 0x748   :  { %v1056_v54 = vmul.f32 0.0625, %v1055_v29 }
 0x74a   :  { %v1057_v53 = vadd.f32 1e-05, %v1056_v54 }
 0x74c   :  { %1631 = vrsqrt.f32 %v1057_v53 }
 0x759   :  { %v1632_v56 = vpop.eup %1631 }
 0x75a   :  { %v1059_v30 = vmul.f32 %v1632_v56, %v1035_v55 }
 0x75c   :  { %v1063_v31 = vrot.slane %v1059_v30, %v1773_v46 }
 0x75e   :  { %v1064_v33 = vmul.f32 %v1063_v31, %v1045_v16  ;;  %v1065_v34 = vmul.f32 %v1063_v31, %v1046_v17 }
 0x760   :  { %v1070_v36 = vadd.f32 %v1306_v32, %v1064_v33  ;;  %v1071_v37 = vadd.f32 %v1306_v32, %v1065_v34 }
 0x762   :  { %v1072_v38 = vadd.f32 %v1070_v36, %v782_v2  ;;  %v1073_v39 = vadd.f32 %v1071_v37, %v783_v1 }
 0x764   :  { %v1074_v40 = vmax.f32 %v1072_v38, 0.0  ;;  %v1075_v41 = vmax.f32 %v1073_v39, 0.0 }
 0x766   :  { %v1079_v46 = vsel %vm1078_vm1, 1.0, %v1074_v40  ;;  %v1080_v42 = vsel %vm1078_vm1, 1.0, %v1075_v41 }
 0x767   :  { %v1081_v44 = vpack.c.bf16 %v1080_v42, %v1079_v46 }
 0x769   :  { %1211 = vmatmul.mubr.bf16.vlgmr.msra.gmra.mxu1 %v1081_v44 }
 0x829   :  { %v1212_v45 = vpop.f32.mrf.mxu1 }
 0x82a   :  { %1221 = vst [vmem:[#allocation7] sm:$0xff] %v1212_v45 }
 0x82b   :  { %v1214_v43 = vpop.f32.mrf.mxu1 }
 0x82c   :  { %1222 = vst [vmem:[#allocation7 + $0x8] sm:$0xff] %v1214_v43 }
 0x82d   :  { %v1216_v47 = vpop.f32.mrf.mxu1 }
 0x82e   :  { %1223 = vst [vmem:[#allocation7 + $0x10] sm:$0xff] %v1216_v47 }
 0x82f   :  { %v1218_v62 = vpop.f32.mrf.mxu1 }
 0x830   :  { %1224 = vst [vmem:[#allocation7 + $0x18] sm:$0xff] %v1218_v62 }
 0x831   :  { %1684 = shalt.err (!%p1681_p0)
}
 0x832   :  { %s1709_s29 = smov 256   ;;  %s1710_s30 = smov 16  }
 0x833   :  { %1236 = dma.vmem_to_hbm [thread:$0]  %s1231_s3, 512, %s1917_s4, [#allocation4], %s1709_s29, %s1709_s29, %s1710_s30  }
 0x834   :  { %1697 = dma.done.wait [#allocation4], 512  }
 0x835   :  { %1698 = vsyncadd [#allocation4], 4294966784 }
 0x836   :  { %1240 = vsyncpa [#allocation3], 1 }
 0x837   :  { %1241 = vsyncpa [#allocation6], 1 }
 0x838   :  { %1242 = vsyncpa [#allocation4], 1 }

</bundles_post_ra>
